<compile_context>
chip_gen: v7x
topology: tpu7x:2x2x1
jax: 0.10.0
libtpu: 0.0.40
codegen_flags: <defaults>
</compile_context>

<pallas_src>
import jax
import jax.numpy as jnp
from jax.experimental import pallas as pl
from jax.experimental.pallas import tpu as pltpu


def _mlp_tail(h1, w2_ref, b2_ref, w3_ref, b3_ref, w4_ref, b4_ref, o_ref):
    """Layers 2..4 on a [H, TILE_N] f32 activation block (batch on lanes).

    Weight refs are bf16 (MXU-native rate on all generations); activations are
    cast to bf16 only for the dot, accumulation is f32, bias-add / tanh stay
    f32 (v5e VPU/EUP have no bf16).
    """
    h2 = jnp.tanh(jnp.dot(w2_ref[...], h1.astype(jnp.bfloat16),
                          preferred_element_type=jnp.float32) + b2_ref[...])
    h3 = jnp.tanh(jnp.dot(w3_ref[...], h2.astype(jnp.bfloat16),
                          preferred_element_type=jnp.float32) + b3_ref[...])
    o_ref[...] = (jnp.dot(w4_ref[...], h3.astype(jnp.bfloat16),
                          preferred_element_type=jnp.float32) + b4_ref[...])


def _pinn_kernel_txyz(txyz_ref, w1_ref, b1_ref, w2_ref, b2_ref,
                      w3_ref, b3_ref, w4_ref, b4_ref, o_ref):
    """Training/validation path: layer 1 is an f32 [H,8] x [8,T] MXU matmul."""
    pre1 = jnp.dot(w1_ref[...], txyz_ref[...],
                   preferred_element_type=jnp.float32) + b1_ref[...]
    _mlp_tail(jnp.tanh(pre1), w2_ref, b2_ref, w3_ref, b3_ref, w4_ref, b4_ref, o_ref)


def _pinn_kernel_t(t_ref, w1c_ref, b1_ref, w2_ref, b2_ref,
                   w3_ref, b3_ref, w4_ref, b4_ref, o_ref):
    """Inference path (x/y/z -> zeros): only W1[:, 0] contributes (precomputed)."""
    pre1 = w1c_ref[...] * t_ref[...] + b1_ref[...]          # [H,1]*[1,T] -> [H,T]
    _mlp_tail(jnp.tanh(pre1), w2_ref, b2_ref, w3_ref, b3_ref, w4_ref, b4_ref, o_ref)


def _round_up(n, m):
    return pl.cdiv(n, m) * m


def _choose_tile(n, tile_n):
    """Lane-dense tile: multiple of 128, capped so grid >= 2 when the batch allows
    (v7x has 2 TensorCores; v5e/v6e are unaffected)."""
    n128 = _round_up(n, 128)
    tile = max(128, (min(int(tile_n), n128) // 128) * 128)
    if n128 >= 256:
        tile = min(tile, max(128, (n128 // 2 // 128) * 128))
    return tile


def pinn_forward(params, t, x=None, y=None, z=None, tile_n=2048):
    """JAX wrapper reproducing TrajectoryPINN.forward. Returns [N, 3] float32."""
    w1, b1, w2, b2, w3, b3, w4, b4 = params
    hidden = w1.shape[0]

    t = jnp.asarray(t, jnp.float32)
    n = t.shape[0]
    tile = _choose_tile(n, tile_n)
    n_pad = _round_up(n, tile)
    grid = (n_pad // tile,)

    # Parameter preprocessing (host-side, one-time):
    #  - layer 1 stays f32 (input precision), layers 2..4 in bf16 for MXU rate
    #  - biases as [out, 1] f32 for lane broadcast
    #  - layer 4 padded 3 -> 8 outputs so the store is a dense (8, tile) slab
    w1f = jnp.asarray(w1, jnp.float32)
    b1f = jnp.asarray(b1, jnp.float32).reshape(hidden, 1)
    w2b = jnp.asarray(w2, jnp.bfloat16)
    w3b = jnp.asarray(w3, jnp.bfloat16)
    b2f = jnp.asarray(b2, jnp.float32).reshape(hidden, 1)
    b3f = jnp.asarray(b3, jnp.float32).reshape(hidden, 1)
    w4p = jnp.pad(jnp.asarray(w4, jnp.float32),
                  ((0, 8 - w4.shape[0]), (0, 0))).astype(jnp.bfloat16)   # [8, H]
    b4p = jnp.pad(jnp.asarray(b4, jnp.float32).reshape(-1, 1),
                  ((0, 8 - b4.shape[0]), (0, 0)))                        # [8, 1]

    have_xyz = x is not None and y is not None and z is not None
    if have_xyz:
        # One [8, n_pad] input slab: rows t,x,y,z + 4 zero rows (K padded to the
        # sublane width) -> single per-tile DMA + one K=8 MXU matmul.
        feats = jnp.stack([jnp.asarray(v, jnp.float32) for v in (t, x, y, z)],
                          axis=0)
        feats = jnp.pad(feats, ((0, 4), (0, n_pad - n)))                 # [8, n_pad]
        w1k = jnp.pad(w1f, ((0, 0), (0, 8 - w1f.shape[1])))              # [H, 8]
        data = [feats]
        data_specs = [pl.BlockSpec((8, tile), lambda i: (0, i))]
        kernel = _pinn_kernel_txyz
        in_rows = 8
    else:
        t_row = jnp.pad(t, (0, n_pad - n)).reshape(1, n_pad)
        w1k = w1f[:, 0:1]                                                # [H, 1]
        data = [t_row]
        data_specs = [pl.BlockSpec((1, tile), lambda i: (0, i))]
        kernel = _pinn_kernel_t
        in_rows = 1

    weights = [w1k, b1f, w2b, b2f, w3b, b3f, w4p, b4p]
    resident = lambda a: pl.BlockSpec(a.shape, lambda i: (0, 0))  # VMEM-resident
    param_specs = [resident(p) for p in weights]
    out_spec = pl.BlockSpec((8, tile), lambda i: (0, i))

    param_bytes = (w1k.size * 4 + b1f.size * 4 + b2f.size * 4 + b3f.size * 4
                   + b4p.size * 4 + (w2b.size + w3b.size + w4p.size) * 2)
    cost = pl.CostEstimate(
        flops=int(2 * n_pad * (in_rows * hidden + 2 * hidden * hidden + 8 * hidden)),
        transcendentals=int(3 * hidden * n_pad),
        bytes_accessed=int(4 * (in_rows + 8) * n_pad + param_bytes),
    )
    cparams = pltpu.CompilerParams(dimension_semantics=("parallel",))

    out_t = pl.pallas_call(
        kernel,
        out_shape=jax.ShapeDtypeStruct((8, n_pad), jnp.float32),
        grid=grid,
        in_specs=data_specs + param_specs,
        out_specs=out_spec,
        compiler_params=cparams,
        cost_estimate=cost,
    )(*data, *weights)

    return out_t[:3, :n].T                                               # [N, 3]


def init_params(key, hidden_dim=128):
    """nn.Linear-style init U(-1/sqrt(fan_in), 1/sqrt(fan_in)).

    Weights kept in PyTorch's [out, in] layout; biases as [out, 1].
    """
    dims = [(4, hidden_dim), (hidden_dim, hidden_dim),
            (hidden_dim, hidden_dim), (hidden_dim, 3)]
    params = []
    for fan_in, fan_out in dims:
        key, kw, kb = jax.random.split(key, 3)
        bound = 1.0 / float(fan_in) ** 0.5
        w = jax.random.uniform(kw, (fan_out, fan_in), jnp.float32, -bound, bound)
        b = jax.random.uniform(kb, (fan_out, 1), jnp.float32, -bound, bound)
        params += [w, b]
    return tuple(params)


if __name__ == "__main__":
    hidden_dim = 128          # module default
    n_points = 200            # small, non-multiple of 128 to exercise padding

    base_key = jax.random.PRNGKey(0)
    kp, kx, ky, kz = jax.random.split(base_key, 4)
    params = init_params(kp, hidden_dim=hidden_dim)

    t = jnp.linspace(0.0, 1.0, n_points, dtype=jnp.float32)
    x = jax.random.normal(kx, (n_points,), jnp.float32)
    y = jax.random.normal(ky, (n_points,), jnp.float32)
    z = jax.random.normal(kz, (n_points,), jnp.float32)

    # Path with positions supplied (training / validation path).
    pred = jax.block_until_ready(pinn_forward(params, t, x, y, z))
    assert pred.shape == (n_points, 3) and pred.dtype == jnp.float32

    # Inference-only path (x/y/z default to zeros, t-only kernel).
    pred0 = jax.block_until_ready(pinn_forward(params, t))
    assert pred0.shape == (n_points, 3)

    # Non-multiple-of-128 tile_n exercises the clamp-to-128-multiple path.
    pred_clamp = jax.block_until_ready(pinn_forward(params, t, x, y, z, tile_n=300))
    assert pred_clamp.shape == (n_points, 3)

    # Pure-JAX f32 reference of the same MLP (standard [N, feature] layout).
    def ref_forward(params, inputs):
        w1, b1, w2, b2, w3, b3, w4, b4 = params
        mm = lambda a, b: jax.lax.dot(a, b, precision=jax.lax.Precision.HIGHEST)
        h = jnp.tanh(mm(inputs, w1.T) + b1[:, 0])
        h = jnp.tanh(mm(h, w2.T) + b2[:, 0])
        h = jnp.tanh(mm(h, w3.T) + b3[:, 0])
        return mm(h, w4.T) + b4[:, 0]

    inputs = jnp.stack([t, x, y, z], axis=1)
    ref = ref_forward(params, inputs)
    # bf16 MXU operands with f32 accumulation vs f32-HIGHEST reference.
    assert jnp.allclose(pred, ref, atol=2e-2, rtol=2e-2), \
        float(jnp.max(jnp.abs(pred - ref)))
    assert jnp.allclose(pred_clamp, ref, atol=2e-2, rtol=2e-2)

    zeros = jnp.zeros_like(t)
    ref0 = ref_forward(params, jnp.stack([t, zeros, zeros, zeros], axis=1))
    assert jnp.allclose(pred0, ref0, atol=2e-2, rtol=2e-2), \
        float(jnp.max(jnp.abs(pred0 - ref0)))

    # TODO(synk): physics_loss / data_loss / training_step / validate_trajectory /
    # refine_trajectory are autograd + Adam training utilities, not part of the
    # forward pass kernelized here.
    print("KERNEL_OK")
</pallas_src>

<mosaic_0001>
module attributes {stable_mosaic.version = 11 : i64} {
  func.func @_pinn_kernel_txyz(%arg0: i32, %arg1: memref<8x128xf32, #tpu.memory_space<vmem>>, %arg2: memref<128x8xf32, #tpu.memory_space<vmem>>, %arg3: memref<128x1xf32, #tpu.memory_space<vmem>>, %arg4: memref<128x128xbf16, #tpu.memory_space<vmem>>, %arg5: memref<128x1xf32, #tpu.memory_space<vmem>>, %arg6: memref<128x128xbf16, #tpu.memory_space<vmem>>, %arg7: memref<128x1xf32, #tpu.memory_space<vmem>>, %arg8: memref<8x128xbf16, #tpu.memory_space<vmem>>, %arg9: memref<8x1xf32, #tpu.memory_space<vmem>>, %arg10: memref<8x128xf32, #tpu.memory_space<vmem>>) attributes {dimension_semantics = [#tpu.dimension_semantics<parallel>], iteration_bounds = array<i64: 2>, scalar_prefetch = 0 : i64, scratch_operands = 0 : i64, tpu.core_type = #tpu.core_type<tc>, window_params = [{transform_indices = @transform_0, window_bounds = array<i64: 8, 128>}, {pipeline_mode = #tpu.pipeline_mode<synchronous>, transform_indices = @transform_1, window_bounds = array<i64: 128, 8>}, {pipeline_mode = #tpu.pipeline_mode<synchronous>, transform_indices = @transform_2, window_bounds = array<i64: 128, 1>}, {pipeline_mode = #tpu.pipeline_mode<synchronous>, transform_indices = @transform_3, window_bounds = array<i64: 128, 128>}, {pipeline_mode = #tpu.pipeline_mode<synchronous>, transform_indices = @transform_4, window_bounds = array<i64: 128, 1>}, {pipeline_mode = #tpu.pipeline_mode<synchronous>, transform_indices = @transform_5, window_bounds = array<i64: 128, 128>}, {pipeline_mode = #tpu.pipeline_mode<synchronous>, transform_indices = @transform_6, window_bounds = array<i64: 128, 1>}, {pipeline_mode = #tpu.pipeline_mode<synchronous>, transform_indices = @transform_7, window_bounds = array<i64: 8, 128>}, {pipeline_mode = #tpu.pipeline_mode<synchronous>, transform_indices = @transform_8, window_bounds = array<i64: 8, 1>}, {transform_indices = @transform_9, window_bounds = array<i64: 8, 128>}]} {
    %c0 = arith.constant 0 : index
    %c0_0 = arith.constant 0 : index
    %0 = vector.load %arg2[%c0, %c0_0] : memref<128x8xf32, #tpu.memory_space<vmem>>, vector<128x8xf32>
    %c0_1 = arith.constant 0 : index
    %c0_2 = arith.constant 0 : index
    %1 = vector.load %arg1[%c0_1, %c0_2] : memref<8x128xf32, #tpu.memory_space<vmem>>, vector<8x128xf32>
    %cst = arith.constant dense<0.000000e+00> : vector<128x128xf32>
    %2 = tpu.matmul %0, %1, %cst {dimension_numbers = #tpu.dot_dimension_numbers<[1], [0], [0], [1], [0, 0, 1, 1], [], []>} : vector<128x8xf32>, vector<8x128xf32>, vector<128x128xf32> -> vector<128x128xf32>
    %c0_3 = arith.constant 0 : index
    %c0_4 = arith.constant 0 : index
    %3 = vector.load %arg3[%c0_3, %c0_4] : memref<128x1xf32, #tpu.memory_space<vmem>>, vector<128x1xf32>
    %4 = vector.broadcast %3 : vector<128x1xf32> to vector<128x128xf32>
    %5 = arith.addf %2, %4 : vector<128x128xf32>
    %6 = math.tanh %5 : vector<128x128xf32>
    %c0_5 = arith.constant 0 : index
    %c0_6 = arith.constant 0 : index
    %7 = vector.load %arg4[%c0_5, %c0_6] : memref<128x128xbf16, #tpu.memory_space<vmem>>, vector<128x128xbf16>
    %8 = arith.truncf %6 : vector<128x128xf32> to vector<128x128xbf16>
    %cst_7 = arith.constant dense<0.000000e+00> : vector<128x128xf32>
    %9 = tpu.matmul %7, %8, %cst_7 {dimension_numbers = #tpu.dot_dimension_numbers<[1], [0], [0], [1], [0, 0, 1, 1], [], []>} : vector<128x128xbf16>, vector<128x128xbf16>, vector<128x128xf32> -> vector<128x128xf32>
    %c0_8 = arith.constant 0 : index
    %c0_9 = arith.constant 0 : index
    %10 = vector.load %arg5[%c0_8, %c0_9] : memref<128x1xf32, #tpu.memory_space<vmem>>, vector<128x1xf32>
    %11 = vector.broadcast %10 : vector<128x1xf32> to vector<128x128xf32>
    %12 = arith.addf %9, %11 : vector<128x128xf32>
    %13 = math.tanh %12 : vector<128x128xf32>
    %c0_10 = arith.constant 0 : index
    %c0_11 = arith.constant 0 : index
    %14 = vector.load %arg6[%c0_10, %c0_11] : memref<128x128xbf16, #tpu.memory_space<vmem>>, vector<128x128xbf16>
    %15 = arith.truncf %13 : vector<128x128xf32> to vector<128x128xbf16>
    %cst_12 = arith.constant dense<0.000000e+00> : vector<128x128xf32>
    %16 = tpu.matmul %14, %15, %cst_12 {dimension_numbers = #tpu.dot_dimension_numbers<[1], [0], [0], [1], [0, 0, 1, 1], [], []>} : vector<128x128xbf16>, vector<128x128xbf16>, vector<128x128xf32> -> vector<128x128xf32>
    %c0_13 = arith.constant 0 : index
    %c0_14 = arith.constant 0 : index
    %17 = vector.load %arg7[%c0_13, %c0_14] : memref<128x1xf32, #tpu.memory_space<vmem>>, vector<128x1xf32>
    %18 = vector.broadcast %17 : vector<128x1xf32> to vector<128x128xf32>
    %19 = arith.addf %16, %18 : vector<128x128xf32>
    %20 = math.tanh %19 : vector<128x128xf32>
    %c0_15 = arith.constant 0 : index
    %c0_16 = arith.constant 0 : index
    %21 = vector.load %arg8[%c0_15, %c0_16] : memref<8x128xbf16, #tpu.memory_space<vmem>>, vector<8x128xbf16>
    %22 = arith.truncf %20 : vector<128x128xf32> to vector<128x128xbf16>
    %cst_17 = arith.constant dense<0.000000e+00> : vector<8x128xf32>
    %23 = tpu.matmul %21, %22, %cst_17 {dimension_numbers = #tpu.dot_dimension_numbers<[1], [0], [0], [1], [0, 0, 1, 1], [], []>} : vector<8x128xbf16>, vector<128x128xbf16>, vector<8x128xf32> -> vector<8x128xf32>
    %c0_18 = arith.constant 0 : index
    %c0_19 = arith.constant 0 : index
    %24 = vector.load %arg9[%c0_18, %c0_19] : memref<8x1xf32, #tpu.memory_space<vmem>>, vector<8x1xf32>
    %25 = vector.broadcast %24 : vector<8x1xf32> to vector<8x128xf32>
    %26 = arith.addf %23, %25 : vector<8x128xf32>
    %c0_20 = arith.constant 0 : index
    %c0_21 = arith.constant 0 : index
    %27 = vector.load %arg10[%c0_20, %c0_21] : memref<8x128xf32, #tpu.memory_space<vmem>>, vector<8x128xf32>
    tpu.vector_store %arg10[%c0_20, %c0_21], %26 {strides = array<i32>} : memref<8x128xf32, #tpu.memory_space<vmem>>, vector<8x128xf32>,
    return
  }
  func.func @transform_0(%arg0: i32) -> (i32, i32) {
    %c0_i32 = arith.constant 0 : i32
    %c0_i32_0 = arith.constant 0 : i32
    return %c0_i32, %arg0 : i32, i32
  }
  func.func @transform_1(%arg0: i32) -> (i32, i32) {
    %c0_i32 = arith.constant 0 : i32
    %c0_i32_0 = arith.constant 0 : i32
    %c0_i32_1 = arith.constant 0 : i32
    return %c0_i32, %c0_i32_0 : i32, i32
  }
  func.func @transform_2(%arg0: i32) -> (i32, i32) {
    %c0_i32 = arith.constant 0 : i32
    %c0_i32_0 = arith.constant 0 : i32
    %c0_i32_1 = arith.constant 0 : i32
    return %c0_i32, %c0_i32_0 : i32, i32
  }
  func.func @transform_3(%arg0: i32) -> (i32, i32) {
    %c0_i32 = arith.constant 0 : i32
    %c0_i32_0 = arith.constant 0 : i32
    %c0_i32_1 = arith.constant 0 : i32
    return %c0_i32, %c0_i32_0 : i32, i32
  }
  func.func @transform_4(%arg0: i32) -> (i32, i32) {
    %c0_i32 = arith.constant 0 : i32
    %c0_i32_0 = arith.constant 0 : i32
    %c0_i32_1 = arith.constant 0 : i32
    return %c0_i32, %c0_i32_0 : i32, i32
  }
  func.func @transform_5(%arg0: i32) -> (i32, i32) {
    %c0_i32 = arith.constant 0 : i32
    %c0_i32_0 = arith.constant 0 : i32
    %c0_i32_1 = arith.constant 0 : i32
    return %c0_i32, %c0_i32_0 : i32, i32
  }
  func.func @transform_6(%arg0: i32) -> (i32, i32) {
    %c0_i32 = arith.constant 0 : i32
    %c0_i32_0 = arith.constant 0 : i32
    %c0_i32_1 = arith.constant 0 : i32
    return %c0_i32, %c0_i32_0 : i32, i32
  }
  func.func @transform_7(%arg0: i32) -> (i32, i32) {
    %c0_i32 = arith.constant 0 : i32
    %c0_i32_0 = arith.constant 0 : i32
    %c0_i32_1 = arith.constant 0 : i32
    return %c0_i32, %c0_i32_0 : i32, i32
  }
  func.func @transform_8(%arg0: i32) -> (i32, i32) {
    %c0_i32 = arith.constant 0 : i32
    %c0_i32_0 = arith.constant 0 : i32
    %c0_i32_1 = arith.constant 0 : i32
    return %c0_i32, %c0_i32_0 : i32, i32
  }
  func.func @transform_9(%arg0: i32) -> (i32, i32) {
    %c0_i32 = arith.constant 0 : i32
    %c0_i32_0 = arith.constant 0 : i32
    return %c0_i32, %arg0 : i32, i32
  }
}

</mosaic_0001>

<bundles_post_ra>
// kernel: tpu_custom_call.1
= control target key start
LH: loop header
LB: loop body
LE: loop exit
PB: predicated region body
PF: predicated region fallthrough
CT: control target
= control target key end

     0   :  { %14 = vsyncpa [#allocation3], 0  ;;  %s2198_s0 = inlined_call_operand.vmem [shape: f32[8,256], index: 0, kind: input, shape index: {}]   ;;  %s2199_s1 = inlined_call_operand.vmem [shape: f32[128,8], index: 1, kind: input, shape index: {}]   ;;  %s2200_s2 = inlined_call_operand.vmem [shape: f32[128,1], index: 2, kind: input, shape index: {}]   ;;  %s2201_s3 = inlined_call_operand.vmem [shape: bf16[128,128], index: 3, kind: input, shape index: {}]   ;;  %s2202_s4 = inlined_call_operand.vmem [shape: f32[128,1], index: 4, kind: input, shape index: {}]   ;;  %s2203_s5 = inlined_call_operand.vmem [shape: bf16[128,128], index: 5, kind: input, shape index: {}]   ;;  %s2204_s6 = inlined_call_operand.vmem [shape: f32[128,1], index: 6, kind: input, shape index: {}]   ;;  %s2205_s7 = inlined_call_operand.vmem [shape: bf16[8,128], index: 7, kind: input, shape index: {}]   ;;  %s2206_s8 = inlined_call_operand.vmem [shape: f32[8,1], index: 8, kind: input, shape index: {}]   ;;  %s2207_s9 = inlined_call_operand.hbm [shape: f32[8,256], index: 9, kind: output, shape index: {}]  }
   0x1   :  { %16 = vsyncpa [#allocation3 + $0x1], 0  ;;  %s1827_s30 = smov 0   ;;  %s1829_s10 = smov 0  }
   0x2   :  { %s1831_s11 = smov 0   ;;  %s1833_s12 = smov 0  }
   0x3 LB: > { %s1848_s13 = sadd.s32 4294967295, %s1771_s12   ;;  %s1343_s14 = sadd.s32 4294967294, %s1771_s12   ;;  %s1771_s12 = sphi %s1833_s12, %s2213_s12   ;;  %s1767_s11 = sphi %s1831_s11, %s2212_s11   ;;  %s1763_s10 = sphi %s1829_s10, %s2211_s10   ;;  %s1759_s30 = sphi %s1827_s30, %s2210_s30  }
   0x4   : > { %s1852_s15 = sadd.s32 1, %s1771_s12   ;;  %s223_s16 = sadd.s32 1, %s1767_s11 }
   0x5   : > { %s220_s17 = ssub.s32 %s1771_s12, %s1852_s15  ;;  %p233_p0 = scmp.ne.s32.totalorder %s1767_s11, %s1763_s10 }
   0x6   : > { %p221_p1 = scmp.eq.s32.totalorder %s220_s17, 0  ;;  %p234_p2 = scmp.eq.s32.totalorder %s1848_s13, 1 }
   0x7   : > { %p239_p3 = scmp.ne.s32.totalorder %s1763_s10, %s1759_s30  ;;  %p240_p4 = scmp.eq.s32.totalorder %s1343_s14, 1 }
   0x8   : > { %s1863_s18 = scalar_select %p221_p1, %s1767_s11, %s223_s16  }
   0x9   : > { %p1865_p5 = por %p234_p2, %p233_p0  ;;  %p1869_p6 = por %p240_p4, %p239_p3 }
   0xa   : > { %p1346_p7 = scmp.ge.s32.totalorder %s1771_s12, 1  ;;  %p289_p8 = scmp.lt.s32.totalorder %s1771_s12, 3 }
   0xc   : > { %p290_p9 = pnand %p1346_p7, %p289_p8 }
   0xd   : > { %v348_v0 = vld [vmem:[%s2200_s2 + $0x10] sm:$0xff] (!%p290_p9)  ;;  %v346_v1 = vld [vmem:[%s2200_s2] sm:$0xff] (!%p290_p9)  ;;  %p324_p10 = scmp.lt.s32.totalorder (!%p290_p9), %s1848_s13, 1  ;;  %vm442_vm0 = vcmask (!%p290_p9), 64512   ;;  %v1773_v2 = vmov (!%p290_p9), 0   ;;  %v349_v4 = vld [vmem:[%s2200_s2 + $0x18] sm:$0xff] (!%p290_p9) }
   0xe   : > { %293 = sbr.rel (%p290_p9) target bundleno = 1039 (0x40f), region = 56  ;;  %1596 = vset.pattern.permute.xlu1 (!%p290_p9), %v1773_v2  ;;  %1595 = vset.pattern.permute.xlu0 (!%p290_p9), %v1773_v2  ;;  %v329_v3 = vld [vmem:[%s2199_s1] sm:$0xff] (!%p290_p9)  ;;  %v347_v5 = vld [vmem:[%s2200_s2 + $0x8] sm:$0xff] (!%p290_p9)  ;;  %v331_v10 = vld [vmem:[%s2199_s1 + $0x10] sm:$0xff] (!%p290_p9)  ;;  %vm1775_vm1 = vmmov (!%p290_p9), 0   ;;  %s321_s22 = sand.u32 (!%p290_p9), 1, %s1763_s10  }
   0xf   : > { %374 = vperm.xlu1 (!%p290_p9), %1596, %v348_v0   ;;  %364 = vperm.xlu0 (!%p290_p9), %1595, %v346_v1   ;;  %v330_v7 = vld [vmem:[%s2199_s1 + $0x8] sm:$0xff] (!%p290_p9)  ;;  %v350_v9 = vld [vmem:[%s2200_s2 + $0x20] sm:$0xff] (!%p290_p9)  ;;  %v332_v11 = vld [vmem:[%s2199_s1 + $0x18] sm:$0xff] (!%p290_p9)  ;;  %s1382_s24 = sshll.u32 (!%p290_p9), %s1848_s13, 7  ;;  %s1776_s16 = smov (!%p290_p9), [#allocation2]  }
  0x10   : > { %1445 = vmatprep.mubr.msk.f32.mxu0 (!%p290_p9), %vm442_vm0, %v329_v3  ;;  %v351_v8 = vld [vmem:[%s2200_s2 + $0x28] sm:$0xff] (!%p290_p9)  ;;  %v353_v12 = vld [vmem:[%s2200_s2 + $0x38] sm:$0xff] (!%p290_p9)  ;;  %v352_v13 = vld [vmem:[%s2200_s2 + $0x30] sm:$0xff] (!%p290_p9)  ;;  %s2156_s14 = scalar_lea.hbm (!%p290_p9), %s2207_s9, %s1382_s24 }
  0x11   : > { %v333_v14 = vld [vmem:[%s2199_s1 + $0x20] sm:$0xff] (!%p290_p9)  ;;  %v334_v15 = vld [vmem:[%s2199_s1 + $0x28] sm:$0xff] (!%p290_p9)  ;;  %v335_v18 = vld [vmem:[%s2199_s1 + $0x30] sm:$0xff] (!%p290_p9) }
  0x12   : > { %v355_v16 = vld [vmem:[%s2200_s2 + $0x48] sm:$0xff] (!%p290_p9)  ;;  %v354_v17 = vld [vmem:[%s2200_s2 + $0x40] sm:$0xff] (!%p290_p9)  ;;  %v336_v19 = vld [vmem:[%s2199_s1 + $0x38] sm:$0xff] (!%p290_p9) }
  0x13   : > { %379 = vperm.xlu1 (!%p290_p9), %1596, %v349_v4   ;;  %369 = vperm.xlu0 (!%p290_p9), %1595, %v347_v5   ;;  %v357_v20 = vld [vmem:[%s2200_s2 + $0x58] sm:$0xff] (!%p290_p9)  ;;  %v356_v21 = vld [vmem:[%s2200_s2 + $0x50] sm:$0xff] (!%p290_p9)  ;;  %v337_v22 = vld [vmem:[%s2199_s1 + $0x40] sm:$0xff] (!%p290_p9) }
  0x14   : > { %v338_v23 = vld [vmem:[%s2199_s1 + $0x48] sm:$0xff] (!%p290_p9)  ;;  %v358_v25 = vld [vmem:[%s2200_s2 + $0x60] sm:$0xff] (!%p290_p9)  ;;  %v339_v26 = vld [vmem:[%s2199_s1 + $0x50] sm:$0xff] (!%p290_p9) }
  0x15   : > { %s325_s27 = scalar_select %p324_p10, %s1848_s13, 1  ;;  %v359_v24 = vld [vmem:[%s2200_s2 + $0x68] sm:$0xff]  ;;  %v340_v27 = vld [vmem:[%s2199_s1 + $0x58] sm:$0xff]  ;;  %v360_v29 = vld [vmem:[%s2200_s2 + $0x70] sm:$0xff] }
  0x16   : > { %v361_v28 = vld [vmem:[%s2200_s2 + $0x78] sm:$0xff]  ;;  %v341_v30 = vld [vmem:[%s2199_s1 + $0x60] sm:$0xff]  ;;  %v342_v31 = vld [vmem:[%s2199_s1 + $0x68] sm:$0xff]  ;;  %s1271_s13 = scalar_lea.sflag [#allocation3], %s321_s22 }
  0x17   : > { %s1348_s17 = sshll.u32 %s325_s27, 3  ;;  %389 = vperm.xlu1 %1596, %v351_v8   ;;  %384 = vperm.xlu0 %1595, %v350_v9   ;;  %v677_v32 = vld [vmem:[%s2202_s4 + $0x8] sm:$0xff]  ;;  %v676_v33 = vld [vmem:[%s2202_s4] sm:$0xff]  ;;  %v343_v34 = vld [vmem:[%s2199_s1 + $0x70] sm:$0xff] }
  0x18   : > { %s327_s23 = scalar_lea.vmem %s2198_s0, %s1348_s17  ;;  %v344_v35 = vld [vmem:[%s2199_s1 + $0x78] sm:$0xff]  ;;  %v678_v37 = vld [vmem:[%s2202_s4 + $0x10] sm:$0xff]  ;;  %v681_v38 = vld [vmem:[%s2202_s4 + $0x28] sm:$0xff]  ;;  %s1713_s17 = sshll.u32 %s1776_s16, 4  ;;  %s1714_s17 = int_to_ptr.vmem [resolvable:$false] %s1713_s17 }
  0x19   : > { %v345_v6 = vld [vmem:[%s327_s23] sm:$0xff]  ;;  %v679_v36 = vld [vmem:[%s2202_s4 + $0x18] sm:$0xff]  ;;  %v682_v41 = vld [vmem:[%s2202_s4 + $0x30] sm:$0xff]  ;;  %s1347_s23 = sshll.u32 %s321_s22, 3  ;;  %s1715_s21 = scalar_lea.vmem %s1714_s17, 256 }
  0x1a   : > { %1443 = vmatprep.subr.mxu0 %v345_v6  ;;  %v680_v39 = vld [vmem:[%s2202_s4 + $0x20] sm:$0xff]  ;;  %v683_v40 = vld [vmem:[%s2202_s4 + $0x38] sm:$0xff]  ;;  %v685_v42 = vld [vmem:[%s2202_s4 + $0x48] sm:$0xff]  ;;  %s323_s25 = scalar_lea.vmem [#allocation2], %s1347_s23 }
  0x1b   : > { %1444 = vmatpush3.msra.mxu0 %v345_v6  ;;  %399 = vperm.xlu1 %1596, %v353_v12   ;;  %v684_v43 = vld [vmem:[%s2202_s4 + $0x40] sm:$0xff]  ;;  %v687_v44 = vld [vmem:[%s2202_s4 + $0x58] sm:$0xff]  ;;  %v686_v45 = vld [vmem:[%s2202_s4 + $0x50] sm:$0xff]  ;;  %s1284_s26 = sshll.u32 %s323_s25, 4  ;;  %s2158_s26 = int_to_ptr.vmem [resolvable:$true] %s1284_s26 }
  0x1c   : > { %1446 = vmatmul.mubr.msk.f32.vlgmr.msra.gmra.mrb[0].mxu0 %vm442_vm0, %v330_v7  ;;  %394 = vperm.xlu0 %1595, %v352_v13   ;;  %v689_v46 = vld [vmem:[%s2202_s4 + $0x68] sm:$0xff]  ;;  %v688_v47 = vld [vmem:[%s2202_s4 + $0x60] sm:$0xff]  ;;  %v691_v48 = vld [vmem:[%s2202_s4 + $0x78] sm:$0xff]  ;;  %s1709_s27 = scalar_lea.vmem %s2158_s26, 128  ;;  %p1716_p0 = scmp.lt.s32.totalorder %s2158_s26, %s1714_s17 }
  0x1d   : > { %1448 = vmatprep.mubr.msk.f32.mxu0 %vm442_vm0, %v331_v10  ;;  %v690_v49 = vld [vmem:[%s2202_s4 + $0x70] sm:$0xff]  ;;  %v958_v50 = vld [vmem:[%s2204_s6 + $0x8] sm:$0xff]  ;;  %v957_v51 = vld [vmem:[%s2204_s6] sm:$0xff]  ;;  %p1710_p11 = scmp.ne.s32.totalorder %s2158_s26, %s1709_s27  ;;  %p1717_p1 = scmp.lt.s32.totalorder %s1715_s21, %s1709_s27 }
  0x1e   : > { %v960_v52 = vld [vmem:[%s2204_s6 + $0x18] sm:$0xff]  ;;  %v959_v53 = vld [vmem:[%s2204_s6 + $0x10] sm:$0xff]  ;;  %v962_v54 = vld [vmem:[%s2204_s6 + $0x28] sm:$0xff] }
  0x1f   : > { %409 = vperm.xlu1 %1596, %v355_v16   ;;  %v961_v55 = vld [vmem:[%s2204_s6 + $0x20] sm:$0xff]  ;;  %v964_v56 = vld [vmem:[%s2204_s6 + $0x38] sm:$0xff]  ;;  %v963_v57 = vld [vmem:[%s2204_s6 + $0x30] sm:$0xff]  ;;  %p1711_p12 = pnand %p1710_p11, %p1865_p5  ;;  %p1718_p2 = por %p1717_p1, %p1716_p0 }
  0x20   : > { %1449 = vmatmul.mubr.msk.f32.gmra.mrb[2].mxu0 %vm442_vm0, %v332_v11  ;;  %404 = vperm.xlu0 %1595, %v354_v17   ;;  %v966_v58 = vld [vmem:[%s2204_s6 + $0x48] sm:$0xff]  ;;  %v965_v59 = vld [vmem:[%s2204_s6 + $0x40] sm:$0xff]  ;;  %v968_v60 = vld [vmem:[%s2204_s6 + $0x58] sm:$0xff] }
  0x21   : > { %1451 = vmatprep.mubr.msk.f32.mxu0 %vm442_vm0, %v333_v14  ;;  %v967_v61 = vld [vmem:[%s2204_s6 + $0x50] sm:$0xff]  ;;  %v970_v62 = vld [vmem:[%s2204_s6 + $0x68] sm:$0xff]  ;;  %v969_v63 = vld [vmem:[%s2204_s6 + $0x60] sm:$0xff]  ;;  %p1712_p13 = pneg %p1711_p12 }
  0x22   : > { %v972_v0 = vld [vmem:[%s2204_s6 + $0x78] sm:$0xff]  ;;  %v971_v1 = vld [vmem:[%s2204_s6 + $0x70] sm:$0xff]  ;;  %v1223_v2 = vld [vmem:[%s2206_s8] sm:$0xff] }
  0x23   : > { %419 = vperm.xlu1 %1596, %v357_v20   ;;  %v1597_v3 = vld [vmem:[%s2201_s3] sm:$0xff]   ;;  %p1719_p3 = pnand %p1718_p2, %p1712_p13 }
  0x24   : > { %1452 = vmatmul.mubr.msk.f32.gmra.mrb[4].mxu0 %vm442_vm0, %v334_v15  ;;  %414 = vperm.xlu0 %1595, %v356_v21  }
  0x25   : > { %1454 = vmatprep.mubr.msk.f32.mxu0 %vm442_vm0, %v335_v18  ;;  %1485 = vmatprep.mubr.bf16.mxu1 %v1597_v3 }
  0x27   : > { %429 = vperm.xlu1 %1596, %v359_v24  }
  0x28   : > { %1455 = vmatmul.mubr.msk.f32.gmra.mrb[6].mxu0 %vm442_vm0, %v336_v19  ;;  %424 = vperm.xlu0 %1595, %v358_v25  }
  0x29   : > { %1457 = vmatprep.mubr.msk.f32.mxu0 %vm442_vm0, %v337_v22 }
  0x2b   : > { %439 = vperm.xlu1 %1596, %v361_v28  }
  0x2c   : > { %1458 = vmatmul.mubr.msk.f32.gmra.mrb[8].mxu0 %vm442_vm0, %v338_v23  ;;  %434 = vperm.xlu0 %1595, %v360_v29  }
  0x2d   : > { %1460 = vmatprep.mubr.msk.f32.mxu0 %vm442_vm0, %v339_v26 }
  0x2f   : > { %699 = vperm.xlu1 %1596, %v677_v32  }
  0x30   : > { %1461 = vmatmul.mubr.msk.f32.gmra.mrb[10].mxu0 %vm442_vm0, %v340_v27  ;;  %694 = vperm.xlu0 %1595, %v676_v33  }
  0x31   : > { %1463 = vmatprep.mubr.msk.f32.mxu0 %vm442_vm0, %v341_v30 }
  0x33   : > { %709 = vperm.xlu1 %1596, %v679_v36  }
  0x34   : > { %1464 = vmatmul.mubr.msk.f32.gmra.mrb[12].mxu0 %vm442_vm0, %v342_v31  ;;  %704 = vperm.xlu0 %1595, %v678_v37  }
  0x35   : > { %1466 = vmatprep.mubr.msk.f32.mxu0 %vm442_vm0, %v343_v34 }
  0x37   : > { %719 = vperm.xlu1 %1596, %v681_v38  }
  0x38   : > { %1467 = vmatmul.mubr.msk.f32.gmra.mrb[14].mxu0 %vm442_vm0, %v344_v35  ;;  %714 = vperm.xlu0 %1595, %v680_v39  }
  0x3b   : > { %729 = vperm.xlu1 %1596, %v683_v40  }
  0x3c   : > { %724 = vperm.xlu0 %1595, %v682_v41  }
  0x3f   : > { %739 = vperm.xlu1 %1596, %v685_v42  }
  0x40   : > { %734 = vperm.xlu0 %1595, %v684_v43  }
  0x43   : > { %749 = vperm.xlu1 %1596, %v687_v44  }
  0x44   : > { %744 = vperm.xlu0 %1595, %v686_v45  }
  0x47   : > { %759 = vperm.xlu1 %1596, %v689_v46  }
  0x48   : > { %754 = vperm.xlu0 %1595, %v688_v47  }
  0x4b   : > { %769 = vperm.xlu1 %1596, %v691_v48  }
  0x4c   : > { %764 = vperm.xlu0 %1595, %v690_v49  }
  0x4f   : > { %980 = vperm.xlu1 %1596, %v958_v50  }
  0x50   : > { %975 = vperm.xlu0 %1595, %v957_v51  }
  0x53   : > { %990 = vperm.xlu1 %1596, %v960_v52  }
  0x54   : > { %985 = vperm.xlu0 %1595, %v959_v53  }
  0x57   : > { %1000 = vperm.xlu1 %1596, %v962_v54  }
  0x58   : > { %995 = vperm.xlu0 %1595, %v961_v55  }
  0x5b   : > { %1010 = vperm.xlu1 %1596, %v964_v56  }
  0x5c   : > { %1005 = vperm.xlu0 %1595, %v963_v57  }
  0x5f   : > { %1020 = vperm.xlu1 %1596, %v966_v58  }
  0x60   : > { %1015 = vperm.xlu0 %1595, %v965_v59  }
  0x63   : > { %1030 = vperm.xlu1 %1596, %v968_v60  }
  0x64   : > { %1025 = vperm.xlu0 %1595, %v967_v61  }
  0x67   : > { %1040 = vperm.xlu1 %1596, %v970_v62  }
  0x68   : > { %1035 = vperm.xlu0 %1595, %v969_v63  }
  0x6b   : > { %1050 = vperm.xlu1 %1596, %v972_v0  }
  0x6c   : > { %1045 = vperm.xlu0 %1595, %v971_v1  }
  0x70   : > { %1226 = vperm.xlu0 %1595, %v1223_v2  }
  0x8e   : > { %v375_v4 = vpop.permute.xlu1 %374  ;;  %v365_v5 = vpop.permute.xlu0 %364 }
  0x92   : > { %v380_v6 = vpop.permute.xlu1 %379  ;;  %v370_v7 = vpop.permute.xlu0 %369 }
  0x96   : > { %v390_v8 = vpop.permute.xlu1 %389  ;;  %v385_v9 = vpop.permute.xlu0 %384 }
  0x9a   : > { %v400_v14 = vpop.permute.xlu1 %399 }
  0x9b   : > { %v395_v16 = vpop.permute.xlu0 %394 }
  0x9e   : > { %v410_v23 = vpop.permute.xlu1 %409 }
  0x9f   : > { %v405_v25 = vpop.permute.xlu0 %404 }
  0xa2   : > { %v420_v32 = vpop.permute.xlu1 %419 }
  0xa3   : > { %v415_v36 = vpop.permute.xlu0 %414 }
  0xa6   : > { %v430_v47 = vpop.permute.xlu1 %429 }
  0xa7   : > { %v425_v49 = vpop.permute.xlu0 %424 }
  0xaa   : > { %v440_v58 = vpop.permute.xlu1 %439 }
  0xab   : > { %v435_v61 = vpop.permute.xlu0 %434 }
  0xef   : > { %v1447_v10 = vpop.f32.mrb[0].mxu0 }
  0xf0   : > { %v563_v11 = vadd.f32 %v1447_v10, %v370_v7  ;;  %v557_v12 = vpop.f32.mrb[1].mxu0 }
  0xf1   : > { %v558_v13 = vadd.f32 %v557_v12, %v365_v5  ;;  %v1598_v12 = vld [vmem:[%s2201_s3 + $0x8] sm:$0xff]  }
  0xf2   : > { %1613 = vtanh.f32 %v563_v11 }
  0xf3   : > { %v1450_v15 = vpop.f32.mrb[2].mxu0  ;;  %1615 = vtanh.f32 %v558_v13  ;;  %v1599_v13 = vld [vmem:[%s2201_s3 + $0x10] sm:$0xff]  }
  0xf4   : > { %v573_v17 = vadd.f32 %v1450_v15, %v380_v6  ;;  %v567_v18 = vpop.f32.mrb[3].mxu0  ;;  %v1601_v15 = vld [vmem:[%s2201_s3 + $0x20] sm:$0xff]  }
  0xf5   : > { %v568_v19 = vadd.f32 %v567_v18, %v375_v4  ;;  %v1604_v18 = vld [vmem:[%s2201_s3 + $0x38] sm:$0xff]  }
  0xf6   : > { %1617 = vtanh.f32 %v573_v17  ;;  %v1603_v17 = vld [vmem:[%s2201_s3 + $0x30] sm:$0xff]  }
  0xf7   : > { %1619 = vtanh.f32 %v568_v19  ;;  %v1453_v20 = vpop.f32.mrb[4].mxu0  ;;  %v1605_v19 = vld [vmem:[%s2203_s5] sm:$0xff]  }
  0xf8   : > { %v583_v21 = vadd.f32 %v1453_v20, %v390_v8  ;;  %v577_v22 = vpop.f32.mrb[5].mxu0  ;;  %1517 = vmatprep.mubr.bf16.mxu0 %v1605_v19  ;;  %v695_v20 = vpop.permute.xlu0 %694 }
  0xf9   : > { %v578_v24 = vadd.f32 %v577_v22, %v385_v9 }
  0xfa   : > { %1621 = vtanh.f32 %v583_v21  ;;  %v700_v21 = vpop.permute.xlu1 %699 }
  0xfb   : > { %1623 = vtanh.f32 %v578_v24  ;;  %v1456_v26 = vpop.f32.mrb[6].mxu0 }
  0xfc   : > { %v1614_v27 = vpop.eup %1613  ;;  %v593_v28 = vadd.f32 %v1456_v26, %v400_v14  ;;  %v587_v29 = vpop.f32.mrb[7].mxu0  ;;  %v1600_v14 = vld [vmem:[%s2201_s3 + $0x18] sm:$0xff]  }
  0xfd   : > { %v588_v30 = vadd.f32 %v587_v29, %v395_v16  ;;  %v1616_v31 = vpop.eup %1615  ;;  %v1602_v16 = vld [vmem:[%s2201_s3 + $0x28] sm:$0xff]   ;;  %v705_v22 = vpop.permute.xlu0 %704 }
  0xfe   : > { %1625 = vtanh.f32 %v593_v28  ;;  %v668_v34 = vpack.c.bf16 %v1614_v27, %v1616_v31 }
  0xff   : > { %1627 = vtanh.f32 %v588_v30  ;;  %v1459_v33 = vpop.f32.mrb[8].mxu0 }
 0x100   : > { %v1618_v35 = vpop.eup %1617  ;;  %v603_v37 = vadd.f32 %v1459_v33, %v410_v23  ;;  %v597_v38 = vpop.f32.mrb[9].mxu0  ;;  %1469 = vmatprep.subr.bf16.mxu1 %v668_v34 }
 0x101   : > { %v1620_v39 = vpop.eup %1619  ;;  %v598_v40 = vadd.f32 %v597_v38, %v405_v25  ;;  %1470 = vmatpush3.bf16.msra.mxu1 %v668_v34  ;;  %v710_v23 = vpop.permute.xlu1 %709 }
 0x102   : > { %1629 = vtanh.f32 %v603_v37  ;;  %v669_v41 = vpack.c.bf16 %v1618_v35, %v1620_v39  ;;  %v715_v24 = vpop.permute.xlu0 %714 }
 0x103   : > { %1631 = vtanh.f32 %v598_v40  ;;  %v1462_v42 = vpop.f32.mrb[10].mxu0 }
 0x104   : > { %v1622_v43 = vpop.eup %1621  ;;  %v613_v44 = vadd.f32 %v1462_v42, %v420_v32  ;;  %v607_v45 = vpop.f32.mrb[11].mxu0  ;;  %1471 = vmatprep.subr.bf16.mxu1 %v669_v41 }
 0x105   : > { %v1624_v46 = vpop.eup %1623  ;;  %v608_v48 = vadd.f32 %v607_v45, %v415_v36  ;;  %1472 = vmatpush3.bf16.msra.mxu1 %v669_v41  ;;  %v720_v25 = vpop.permute.xlu1 %719 }
 0x106   : > { %1633 = vtanh.f32 %v613_v44  ;;  %v670_v50 = vpack.c.bf16 %v1622_v43, %v1624_v46  ;;  %v725_v26 = vpop.permute.xlu0 %724 }
 0x107   : > { %1635 = vtanh.f32 %v608_v48  ;;  %v1465_v51 = vpop.f32.mrb[12].mxu0 }
 0x108   : > { %v1626_v52 = vpop.eup %1625  ;;  %v623_v53 = vadd.f32 %v1465_v51, %v430_v47  ;;  %v617_v54 = vpop.f32.mrb[13].mxu0  ;;  %1473 = vmatprep.subr.bf16.mxu1 %v670_v50 }
 0x109   : > { %v1628_v55 = vpop.eup %1627  ;;  %v618_v56 = vadd.f32 %v617_v54, %v425_v49  ;;  %1474 = vmatpush3.bf16.msra.mxu1 %v670_v50  ;;  %v730_v30 = vpop.permute.xlu1 %729 }
 0x10a   : > { %1637 = vtanh.f32 %v623_v53  ;;  %v671_v57 = vpack.c.bf16 %v1626_v52, %v1628_v55  ;;  %v735_v36 = vpop.permute.xlu0 %734 }
 0x10b   : > { %1639 = vtanh.f32 %v618_v56  ;;  %v1468_v59 = vpop.f32.mrb[14].mxu0 }
 0x10c   : > { %v1630_v60 = vpop.eup %1629  ;;  %v633_v62 = vadd.f32 %v1468_v59, %v440_v58  ;;  %v627_v63 = vpop.f32.mrb[15].mxu0  ;;  %1475 = vmatprep.subr.bf16.mxu1 %v671_v57 }
 0x10d   : > { %v1632_v0 = vpop.eup %1631  ;;  %v628_v1 = vadd.f32 %v627_v63, %v435_v61  ;;  %1476 = vmatpush3.bf16.msra.mxu1 %v671_v57  ;;  %v740_v37 = vpop.permute.xlu1 %739 }
 0x10e   : > { %1641 = vtanh.f32 %v633_v62  ;;  %v672_v2 = vpack.c.bf16 %v1630_v60, %v1632_v0  ;;  %v745_v45 = vpop.permute.xlu0 %744 }
 0x10f   : > { %1643 = vtanh.f32 %v628_v1 }
 0x110   : > { %v1634_v3 = vpop.eup %1633  ;;  %1477 = vmatprep.subr.bf16.mxu1 %v672_v2 }
 0x111   : > { %v1636_v4 = vpop.eup %1635  ;;  %1478 = vmatpush3.bf16.msra.mxu1 %v672_v2  ;;  %v750_v49 = vpop.permute.xlu1 %749 }
 0x112   : > { %v673_v5 = vpack.c.bf16 %v1634_v3, %v1636_v4  ;;  %v755_v57 = vpop.permute.xlu0 %754 }
 0x114   : > { %v1638_v6 = vpop.eup %1637  ;;  %1479 = vmatprep.subr.bf16.mxu1 %v673_v5 }
 0x115   : > { %v1640_v7 = vpop.eup %1639  ;;  %1480 = vmatpush3.bf16.msra.mxu1 %v673_v5  ;;  %v760_v62 = vpop.permute.xlu1 %759 }
 0x116   : > { %v674_v8 = vpack.c.bf16 %v1638_v6, %v1640_v7  ;;  %v765_v4 = vpop.permute.xlu0 %764 }
 0x118   : > { %v1642_v9 = vpop.eup %1641  ;;  %1481 = vmatprep.subr.bf16.mxu1 %v674_v8 }
 0x119   : > { %v1644_v10 = vpop.eup %1643  ;;  %1482 = vmatpush3.bf16.msra.mxu1 %v674_v8 }
 0x11a   : > { %v675_v11 = vpack.c.bf16 %v1642_v9, %v1644_v10  ;;  %v770_v10 = vpop.permute.xlu1 %769 }
 0x11c   : > { %1483 = vmatprep.subr.bf16.mxu1 %v675_v11 }
 0x11d   : > { %1484 = vmatpush3.bf16.msra.mxu1 %v675_v11 }
 0x120   : > { %1486 = vmatmul.mubr.bf16.vlgmr.msra.gmra.mrb[0].mxu1 %v1598_v12 }
 0x121   : > { %1489 = vmatprep.mubr.bf16.mxu1 %v1599_v13 }
 0x128   : > { %1490 = vmatmul.mubr.bf16.gmra.mrb[4].mxu1 %v1600_v14 }
 0x129   : > { %1493 = vmatprep.mubr.bf16.mxu1 %v1601_v15 }
 0x130   : > { %1494 = vmatmul.mubr.bf16.gmra.mrb[8].mxu1 %v1602_v16 }
 0x131   : > { %1497 = vmatprep.mubr.bf16.mxu1 %v1603_v17 }
 0x138   : > { %1498 = vmatmul.mubr.bf16.gmra.mrb[12].mxu1 %v1604_v18 }
 0x1f3   : > { %v1487_v27 = vpop.f32.mrb[0].mxu1 }
 0x1f4   : > { %v863_v28 = vadd.f32 %v1487_v27, %v705_v22  ;;  %v854_v29 = vpop.f32.mrb[1].mxu1 }
 0x1f5   : > { %v855_v31 = vadd.f32 %v854_v29, %v695_v20  ;;  %v1488_v32 = vpop.f32.mrb[2].mxu1  ;;  %v1607_v29 = vld [vmem:[%s2203_s5 + $0x10] sm:$0xff]  }
 0x1f6   : > { %1645 = vtanh.f32 %v863_v28  ;;  %v866_v33 = vadd.f32 %v1488_v32, %v710_v23  ;;  %v857_v34 = vpop.f32.mrb[3].mxu1  ;;  %v1606_v28 = vld [vmem:[%s2203_s5 + $0x8] sm:$0xff]  }
 0x1f7   : > { %1647 = vtanh.f32 %v855_v31  ;;  %v858_v35 = vadd.f32 %v857_v34, %v700_v21  ;;  %v1609_v31 = vld [vmem:[%s2203_s5 + $0x20] sm:$0xff]   ;;  %v1610_v32 = vld [vmem:[%s2203_s5 + $0x28] sm:$0xff]   ;;  %v1612_v34 = vld [vmem:[%s2203_s5 + $0x38] sm:$0xff]  }
 0x1f8   : > { %1649 = vtanh.f32 %v866_v33  ;;  %v1611_v33 = vld [vmem:[%s2203_s5 + $0x30] sm:$0xff]  }
 0x1f9   : > { %1651 = vtanh.f32 %v858_v35  ;;  %v1774_v35 = vmov 0.0  }
 0x1fa   : > { %1533 = vmatprep.subr.bf16.mxu1 %v1774_v35  ;;  %1549 = vmatprep.mubr.msk.bf16.mxu1 %vm1775_vm1, %v1774_v35 }
 0x1fb   : > { %v1491_v38 = vpop.f32.mrb[4].mxu1 }
 0x1fc   : > { %v879_v39 = vadd.f32 %v1491_v38, %v725_v26  ;;  %v870_v40 = vpop.f32.mrb[5].mxu1 }
 0x1fd   : > { %v871_v41 = vadd.f32 %v870_v40, %v715_v24  ;;  %v1492_v42 = vpop.f32.mrb[6].mxu1 }
 0x1fe   : > { %1653 = vtanh.f32 %v879_v39  ;;  %v882_v43 = vadd.f32 %v1492_v42, %v730_v30  ;;  %v873_v44 = vpop.f32.mrb[7].mxu1  ;;  %v1608_v30 = vld [vmem:[%s2203_s5 + $0x18] sm:$0xff]  }
 0x1ff   : > { %1655 = vtanh.f32 %v871_v41  ;;  %v874_v46 = vadd.f32 %v873_v44, %v720_v25 }
 0x200   : > { %v1646_v47 = vpop.eup %1645  ;;  %1657 = vtanh.f32 %v882_v43 }
 0x201   : > { %v1648_v48 = vpop.eup %1647  ;;  %1659 = vtanh.f32 %v874_v46 }
 0x202   : > { %v1650_v50 = vpop.eup %1649 }
 0x203   : > { %v1652_v51 = vpop.eup %1651  ;;  %v1495_v52 = vpop.f32.mrb[8].mxu1  ;;  %v950_v53 = vpack.c.bf16 %v1650_v50, %v1646_v47 }
 0x204   : > { %v895_v54 = vadd.f32 %v1495_v52, %v745_v45  ;;  %v886_v55 = vpop.f32.mrb[9].mxu1  ;;  %v949_v56 = vpack.c.bf16 %v1652_v51, %v1648_v48 }
 0x205   : > { %v887_v58 = vadd.f32 %v886_v55, %v735_v36  ;;  %v1496_v59 = vpop.f32.mrb[10].mxu1  ;;  %v976_v36 = vpop.permute.xlu0 %975 }
 0x206   : > { %1661 = vtanh.f32 %v895_v54  ;;  %v898_v60 = vadd.f32 %v1496_v59, %v750_v49  ;;  %v889_v61 = vpop.f32.mrb[11].mxu1  ;;  %1501 = vmatprep.subr.bf16.mxu0 %v949_v56 }
 0x207   : > { %1663 = vtanh.f32 %v887_v58  ;;  %v890_v63 = vadd.f32 %v889_v61, %v740_v37  ;;  %1502 = vmatpush3.bf16.msra.mxu0 %v949_v56  ;;  %v981_v37 = vpop.permute.xlu1 %980 }
 0x208   : > { %v1654_v0 = vpop.eup %1653  ;;  %1665 = vtanh.f32 %v898_v60  ;;  %1503 = vmatprep.subr.bf16.mxu0 %v950_v53 }
 0x209   : > { %v1656_v1 = vpop.eup %1655  ;;  %1667 = vtanh.f32 %v890_v63  ;;  %v986_v38 = vpop.permute.xlu0 %985 }
 0x20a   : > { %v1658_v2 = vpop.eup %1657 }
 0x20b   : > { %v1660_v3 = vpop.eup %1659  ;;  %v1499_v5 = vpop.f32.mrb[12].mxu1  ;;  %1504 = vmatpush3.bf16.msra.mxu0 %v950_v53  ;;  %v952_v6 = vpack.c.bf16 %v1658_v2, %v1654_v0 }
 0x20c   : > { %v911_v7 = vadd.f32 %v1499_v5, %v765_v4  ;;  %v902_v8 = vpop.f32.mrb[13].mxu1  ;;  %v951_v9 = vpack.c.bf16 %v1660_v3, %v1656_v1  ;;  %v991_v39 = vpop.permute.xlu1 %990 }
 0x20d   : > { %v903_v11 = vadd.f32 %v902_v8, %v755_v57  ;;  %v1500_v12 = vpop.f32.mrb[14].mxu1  ;;  %v996_v40 = vpop.permute.xlu0 %995 }
 0x20e   : > { %1669 = vtanh.f32 %v911_v7  ;;  %v914_v13 = vadd.f32 %v1500_v12, %v770_v10  ;;  %v905_v14 = vpop.f32.mrb[15].mxu1  ;;  %1505 = vmatprep.subr.bf16.mxu0 %v951_v9 }
 0x20f   : > { %1671 = vtanh.f32 %v903_v11  ;;  %v906_v15 = vadd.f32 %v905_v14, %v760_v62  ;;  %1506 = vmatpush3.bf16.msra.mxu0 %v951_v9 }
 0x210   : > { %v1662_v16 = vpop.eup %1661  ;;  %1673 = vtanh.f32 %v914_v13  ;;  %1507 = vmatprep.subr.bf16.mxu0 %v952_v6  ;;  %v1001_v41 = vpop.permute.xlu1 %1000 }
 0x211   : > { %v1664_v17 = vpop.eup %1663  ;;  %1675 = vtanh.f32 %v906_v15  ;;  %v1006_v42 = vpop.permute.xlu0 %1005 }
 0x212   : > { %v1666_v18 = vpop.eup %1665 }
 0x213   : > { %v1668_v19 = vpop.eup %1667  ;;  %1508 = vmatpush3.bf16.msra.mxu0 %v952_v6  ;;  %v954_v20 = vpack.c.bf16 %v1666_v18, %v1662_v16 }
 0x214   : > { %v953_v21 = vpack.c.bf16 %v1668_v19, %v1664_v17  ;;  %v1011_v46 = vpop.permute.xlu1 %1010 }
 0x215   : > { %v1016_v52 = vpop.permute.xlu0 %1015 }
 0x216   : > { %1509 = vmatprep.subr.bf16.mxu0 %v953_v21 }
 0x217   : > { %1510 = vmatpush3.bf16.msra.mxu0 %v953_v21 }
 0x218   : > { %v1670_v22 = vpop.eup %1669  ;;  %1511 = vmatprep.subr.bf16.mxu0 %v954_v20  ;;  %v1021_v53 = vpop.permute.xlu1 %1020 }
 0x219   : > { %v1672_v23 = vpop.eup %1671  ;;  %v1026_v61 = vpop.permute.xlu0 %1025 }
 0x21a   : > { %v1674_v24 = vpop.eup %1673 }
 0x21b   : > { %v1676_v25 = vpop.eup %1675  ;;  %1512 = vmatpush3.bf16.msra.mxu0 %v954_v20  ;;  %v956_v26 = vpack.c.bf16 %v1674_v24, %v1670_v22 }
 0x21c   : > { %v955_v27 = vpack.c.bf16 %v1676_v25, %v1672_v23  ;;  %v1031_v1 = vpop.permute.xlu1 %1030 }
 0x21d   : > { %v1036_v9 = vpop.permute.xlu0 %1035 }
 0x21e   : > { %1513 = vmatprep.subr.bf16.mxu0 %v955_v27 }
 0x21f   : > { %1514 = vmatpush3.bf16.msra.mxu0 %v955_v27 }
 0x220   : > { %1515 = vmatprep.subr.bf16.mxu0 %v956_v26  ;;  %v1041_v14 = vpop.permute.xlu1 %1040 }
 0x221   : > { %v1046_v20 = vpop.permute.xlu0 %1045 }
 0x223   : > { %1516 = vmatpush3.bf16.msra.mxu0 %v956_v26 }
 0x224   : > { %v1051_v26 = vpop.permute.xlu1 %1050 }
 0x226   : > { %1518 = vmatmul.mubr.bf16.vlgmr.msra.gmra.mrb[16].mxu0 %v1606_v28 }
 0x227   : > { %1521 = vmatprep.mubr.bf16.mxu0 %v1607_v29 }
 0x22e   : > { %1522 = vmatmul.mubr.bf16.gmra.mrb[20].mxu0 %v1608_v30 }
 0x22f   : > { %1525 = vmatprep.mubr.bf16.mxu0 %v1609_v31 }
 0x236   : > { %1526 = vmatmul.mubr.bf16.gmra.mrb[24].mxu0 %v1610_v32 }
 0x237   : > { %1529 = vmatprep.mubr.bf16.mxu0 %v1611_v33 }
 0x23e   : > { %1530 = vmatmul.mubr.bf16.gmra.mrb[28].mxu0 %v1612_v34 }
 0x2f9   : > { %v1519_v43 = vpop.f32.mrb[16].mxu0 }
 0x2fa   : > { %v1144_v44 = vadd.f32 %v1519_v43, %v986_v38  ;;  %v1135_v45 = vpop.f32.mrb[17].mxu0 }
 0x2fb   : > { %v1136_v47 = vadd.f32 %v1135_v45, %v976_v36  ;;  %v1520_v48 = vpop.f32.mrb[18].mxu0  ;;  %v1214_v45 = vld [vmem:[%s2205_s7] sm:$0xf] }
 0x2fc   : > { %1677 = vtanh.f32 %v1144_v44  ;;  %v1147_v49 = vadd.f32 %v1520_v48, %v991_v39  ;;  %v1138_v50 = vpop.f32.mrb[19].mxu0 }
 0x2fd   : > { %1679 = vtanh.f32 %v1136_v47  ;;  %v1139_v51 = vadd.f32 %v1138_v50, %v981_v37 }
 0x2fe   : > { %1681 = vtanh.f32 %v1147_v49 }
 0x2ff   : > { %1683 = vtanh.f32 %v1139_v51 }
 0x301   : > { %v1523_v54 = vpop.f32.mrb[20].mxu0 }
 0x302   : > { %v1160_v55 = vadd.f32 %v1523_v54, %v1006_v42  ;;  %v1151_v56 = vpop.f32.mrb[21].mxu0 }
 0x303   : > { %v1152_v57 = vadd.f32 %v1151_v56, %v996_v40  ;;  %v1524_v58 = vpop.f32.mrb[22].mxu0 }
 0x304   : > { %1685 = vtanh.f32 %v1160_v55  ;;  %v1163_v59 = vadd.f32 %v1524_v58, %v1011_v46  ;;  %v1154_v60 = vpop.f32.mrb[23].mxu0  ;;  %v1227_v46 = vpop.permute.xlu0 %1226 }
 0x305   : > { %1687 = vtanh.f32 %v1152_v57  ;;  %v1155_v62 = vadd.f32 %v1154_v60, %v1001_v41 }
 0x306   : > { %v1678_v63 = vpop.eup %1677  ;;  %1689 = vtanh.f32 %v1163_v59 }
 0x307   : > { %v1680_v0 = vpop.eup %1679  ;;  %1691 = vtanh.f32 %v1155_v62 }
 0x308   : > { %v1682_v2 = vpop.eup %1681 }
 0x309   : > { %v1684_v3 = vpop.eup %1683  ;;  %v1527_v4 = vpop.f32.mrb[24].mxu0  ;;  %v1216_v5 = vpack.c.bf16 %v1682_v2, %v1678_v63 }
 0x30a   : > { %v1176_v6 = vadd.f32 %v1527_v4, %v1026_v61  ;;  %v1167_v7 = vpop.f32.mrb[25].mxu0  ;;  %v1215_v8 = vpack.c.bf16 %v1684_v3, %v1680_v0 }
 0x30b   : > { %v1168_v10 = vadd.f32 %v1167_v7, %v1016_v52  ;;  %v1528_v11 = vpop.f32.mrb[26].mxu0 }
 0x30c   : > { %1693 = vtanh.f32 %v1176_v6  ;;  %v1179_v12 = vadd.f32 %v1528_v11, %v1031_v1  ;;  %v1170_v13 = vpop.f32.mrb[27].mxu0  ;;  %1534 = vmatpush3.bf16.msra.mxu1 %v1215_v8 }
 0x30d   : > { %1695 = vtanh.f32 %v1168_v10  ;;  %v1171_v15 = vadd.f32 %v1170_v13, %v1021_v53  ;;  %1535 = vmatprep.subr.bf16.mxu1 %v1774_v35 }
 0x30e   : > { %v1686_v16 = vpop.eup %1685  ;;  %1697 = vtanh.f32 %v1179_v12 }
 0x30f   : > { %v1688_v17 = vpop.eup %1687  ;;  %1699 = vtanh.f32 %v1171_v15 }
 0x310   : > { %v1690_v18 = vpop.eup %1689  ;;  %1536 = vmatpush3.bf16.msra.mxu1 %v1216_v5 }
 0x311   : > { %v1692_v19 = vpop.eup %1691  ;;  %v1531_v21 = vpop.f32.mrb[28].mxu0  ;;  %1537 = vmatprep.subr.bf16.mxu1 %v1774_v35  ;;  %v1218_v22 = vpack.c.bf16 %v1690_v18, %v1686_v16 }
 0x312   : > { %v1192_v23 = vadd.f32 %v1531_v21, %v1046_v20  ;;  %v1183_v24 = vpop.f32.mrb[29].mxu0  ;;  %v1217_v25 = vpack.c.bf16 %v1692_v19, %v1688_v17 }
 0x313   : > { %v1184_v27 = vadd.f32 %v1183_v24, %v1036_v9  ;;  %v1532_v28 = vpop.f32.mrb[30].mxu0 }
 0x314   : > { %1701 = vtanh.f32 %v1192_v23  ;;  %v1195_v29 = vadd.f32 %v1532_v28, %v1051_v26  ;;  %v1186_v30 = vpop.f32.mrb[31].mxu0  ;;  %1538 = vmatpush3.bf16.msra.mxu1 %v1217_v25 }
 0x315   : > { %1703 = vtanh.f32 %v1184_v27  ;;  %v1187_v31 = vadd.f32 %v1186_v30, %v1041_v14  ;;  %1539 = vmatprep.subr.bf16.mxu1 %v1774_v35 }
 0x316   : > { %v1694_v32 = vpop.eup %1693  ;;  %1705 = vtanh.f32 %v1195_v29 }
 0x317   : > { %v1696_v33 = vpop.eup %1695  ;;  %1707 = vtanh.f32 %v1187_v31 }
 0x318   : > { %v1698_v34 = vpop.eup %1697  ;;  %1540 = vmatpush3.bf16.msra.mxu1 %v1218_v22 }
 0x319   : > { %v1700_v36 = vpop.eup %1699  ;;  %1541 = vmatprep.subr.bf16.mxu1 %v1774_v35  ;;  %v1220_v37 = vpack.c.bf16 %v1698_v34, %v1694_v32 }
 0x31a   : > { %v1219_v38 = vpack.c.bf16 %v1700_v36, %v1696_v33 }
 0x31c   : > { %1542 = vmatpush3.bf16.msra.mxu1 %v1219_v38 }
 0x31d   : > { %1543 = vmatprep.subr.bf16.mxu1 %v1774_v35 }
 0x31e   : > { %v1702_v39 = vpop.eup %1701 }
 0x31f   : > { %v1704_v40 = vpop.eup %1703 }
 0x320   : > { %v1706_v41 = vpop.eup %1705  ;;  %1544 = vmatpush3.bf16.msra.mxu1 %v1220_v37 }
 0x321   : > { %v1708_v42 = vpop.eup %1707  ;;  %1545 = vmatprep.subr.bf16.mxu1 %v1774_v35  ;;  %v1222_v43 = vpack.c.bf16 %v1706_v41, %v1702_v39 }
 0x322   : > { %v1221_v44 = vpack.c.bf16 %v1708_v42, %v1704_v40 }
 0x324   : > { %1546 = vmatpush3.bf16.msra.mxu1 %v1221_v44 }
 0x325   : > { %1547 = vmatprep.subr.bf16.mxu1 %v1774_v35 }
 0x328   : > { %1548 = vmatpush3.bf16.msra.mxu1 %v1222_v43 }
 0x32b   : > { %1550 = vmatmul.mubr.bf16.vlgmr.msra.gmra.mrb[16].mxu1 %v1214_v45 }
 0x3fe   : > { %v1263_v47 = vpop.f32.mrb[16].mxu1 }
 0x3ff   : > { %v1264_v48 = vadd.f32 %v1263_v47, %v1227_v46  ;;  %v1551_v49 = vpop.f32.mrb[17].mxu1 }
 0x400   : > { %v1266_v35 = vpop.f32.mrb[18].mxu1 }
 0x401   : > { %1269 = vst [vmem:[%s323_s25] sm:$0xff] %v1264_v48  ;;  %v1552_v50 = vpop.f32.mrb[19].mxu1 }
 0x402   : > { %1722 = shalt.err (!%p1719_p3)
}
 0x403   : > { %s1723_s22 = scalar_lea.hbm %s2156_s14, 128  ;;  %s1727_s25 = scalar_lea.hbm %s2207_s9, 256 }
 0x404   : > { %p1724_p4 = scmp.ne.s32.totalorder %s2156_s14, %s1723_s22  ;;  %p1728_p9 = scmp.lt.u32.totalorder %s2156_s14, %s2207_s9 }
 0x405   : > { %p1729_p10 = scmp.lt.u32.totalorder %s1727_s25, %s1723_s22  ;;  %p1731_p12 = scmp.lt.u32.totalorder %s1723_s22, %s2156_s14 }
 0x406   : > { %p1725_p7 = pnand %p1724_p4, %p1865_p5 }
 0x407   : > { %p1730_p11 = por %p1729_p10, %p1728_p9 }
 0x408   : > { %p1726_p8 = pneg %p1725_p7 }
 0x409   : > { %p1732_p13 = por %p1731_p12, %p1730_p11 }
 0x40b   : > { %p1733_p0 = pnand %p1732_p13, %p1726_p8 }
 0x40d   : > { %1736 = shalt.err (!%p1733_p0)
}
 0x40e   : > { %1553 = dma.vmem_to_hbm [thread:$0]  (%p1865_p5), %s2158_s26, 128, %s2156_s14, %s1271_s13  }
 0x40f PF: > { %p1559_p1 = scmp.ge.s32.totalorder %s1771_s12, 2  ;;  %s1296_s27 = sand.u32 1, %s1759_s30  }
 0x410   : > { %s1297_s16 = scalar_lea.sflag [#allocation3], %s1296_s27 }
 0x411   : > { %p1556_p2 = pnand %p1559_p1, %p1869_p6 }
 0x413   : > { %1754 = dma.done.wait (!%p1556_p2), %s1297_s16, 128  }
 0x414   : > { %1756 = vsyncadd (!%p1556_p2), %s1297_s16, 4294967168  ;;  %p19_p3 = scmp.ge.s32.totalorder %s1852_s15, 4   ;;  %s2210_s30 = smov %s1763_s10 }
 0x415   : > { %s2211_s10 = smov %s1767_s11  ;;  %s2212_s11 = smov %s1863_s18 }
 0x416   : > { %s2213_s12 = smov %s1852_s15  ;;  %21 = sbr.rel (!%p19_p3) target bundleno = 3 (0x3), region = 91 }
 0x41d   :  { %1302 = vsyncpa [#allocation3], 1 }
 0x41e   :  { %1304 = vsyncpa [#allocation3 + $0x1], 1 }

</bundles_post_ra>
